<compile_context>
chip_gen: v7x
topology: tpu7x:2x2x1
jax: 0.10.0
libtpu: 0.0.40
codegen_flags: <defaults>
</compile_context>

<pallas_src>
import jax
import jax.numpy as jnp
from jax import lax
from jax.experimental import pallas as pl
from jax.experimental.pallas import tpu as pltpu  # noqa: F401  (TPU backend)


# --------------------------------------------------------------------------
# Kernel 1: big batched projection  (M, K) @ (K, N) + (1, N) -> (M, N)
# Used for both the hoisted input projection and the hoisted FC layer.
# --------------------------------------------------------------------------
def _proj_bias_kernel(a_ref, w_ref, b_ref, o_ref):
    o_ref[...] = (
        jnp.dot(a_ref[...], w_ref[...], preferred_element_type=jnp.float32)
        + b_ref[...]
    ).astype(o_ref.dtype)


def _proj_bias(a, w, b):
    M = a.shape[0]
    N = w.shape[1]
    # Full-array blocks (default): everything lands in VMEM, single invocation.
    return pl.pallas_call(
        _proj_bias_kernel,
        out_shape=jax.ShapeDtypeStruct((M, N), jnp.float32),
    )(a, w, b)


# --------------------------------------------------------------------------
# Kernel 2: the irreducible LSTM recurrence (single invocation, no grid).
#   xw   : (T, B, 4H)  precomputed input projection (incl. both biases)
#   whh  : (H, 4H)     recurrent weight, transposed
#   h0,c0: (B, H)      initial state
# Outputs: h_all (T, B, H), h_n (B, H), c_n (B, H)
# --------------------------------------------------------------------------
def _lstm_recurrence_kernel(xw_ref, whh_ref, h0_ref, c0_ref,
                            hall_ref, hn_ref, cn_ref):
    T = xw_ref.shape[0]
    H = h0_ref.shape[-1]

    whh = whh_ref[...]  # hoist weight load out of the loop (lives in vregs)

    def step(t, carry):
        h_prev, c_prev = carry
        # gates = xW[t] + h_prev @ W_hh^T      (B, 4H)
        gates = xw_ref[t] + jnp.dot(h_prev, whh,
                                    preferred_element_type=jnp.float32)
        # PyTorch gate ordering: i, f, g, o
        i_g = jax.nn.sigmoid(gates[:, 0 * H:1 * H])
        f_g = jax.nn.sigmoid(gates[:, 1 * H:2 * H])
        g_g = jnp.tanh(gates[:, 2 * H:3 * H])
        o_g = jax.nn.sigmoid(gates[:, 3 * H:4 * H])

        c_new = f_g * c_prev + i_g * g_g
        h_new = o_g * jnp.tanh(c_new)

        hall_ref[t] = h_new
        return h_new, c_new

    h_last, c_last = lax.fori_loop(
        0, T, step, (h0_ref[...], c0_ref[...]), unroll=True
    )
    # Final-state writes happen exactly once, after the loop.
    hn_ref[...] = h_last
    cn_ref[...] = c_last


def _lstm_recurrence(xw, w_hh_t, h0, c0):
    T, B, _ = xw.shape
    H = h0.shape[-1]
    return pl.pallas_call(
        _lstm_recurrence_kernel,
        out_shape=(
            jax.ShapeDtypeStruct((T, B, H), jnp.float32),  # h_all
            jax.ShapeDtypeStruct((B, H), jnp.float32),     # h_n
            jax.ShapeDtypeStruct((B, H), jnp.float32),     # c_n
        ),
    )(xw, w_hh_t, h0, c0)


# --------------------------------------------------------------------------
# Full forward pass (mirrors CharLSTM.forward with n_layers=1).
# --------------------------------------------------------------------------
@jax.jit
def char_lstm_forward(tokens, hidden, params):
    """tokens: (B, T) int32; hidden: (h0, c0) each (1, B, H).
    Returns (logits (B*T, O), (h_n, c_n))."""
    emb = params["embedding"]          # (V, H)
    w_ih_t = params["w_ih_t"]          # (H, 4H)
    w_hh_t = params["w_hh_t"]          # (H, 4H)
    b = params["b"]                    # (1, 4H)  = b_ih + b_hh
    w_fc_t = params["w_fc_t"]          # (H, O)
    b_fc = params["b_fc"]              # (1, O)

    B, T = tokens.shape
    H = emb.shape[1]
    O = w_fc_t.shape[1]

    h0, c0 = hidden
    h0 = h0[0].astype(jnp.float32)     # (B, H)
    c0 = c0[0].astype(jnp.float32)     # (B, H)

    # Embedding gather directly in time-major order (transpose the tiny int
    # token matrix instead of the float activations).
    x_tm = jnp.take(emb, tokens.T, axis=0)             # (T, B, H)
    x_flat = x_tm.reshape(T * B, H)                    # contiguous reshape

    # Hoisted input projection: one big MXU matmul for all timesteps.
    xw = _proj_bias(x_flat, w_ih_t, b)                 # (T*B, 4H)
    xw = xw.reshape(T, B, 4 * H)

    # Serial part only: the LSTM recurrence.
    h_all, h_n, c_n = _lstm_recurrence(xw, w_hh_t, h0, c0)

    # Hoisted FC projection, lane-dense output (pad O up to a multiple of 128).
    # TODO(synk): on v6e/v7x the matmul operands could be cast to bfloat16 for
    # extra MXU throughput; kept float32 here to match PyTorch numerics.
    o_pad = max(128, ((O + 127) // 128) * 128)
    w_fc_pad = jnp.zeros((H, o_pad), jnp.float32).at[:, :O].set(w_fc_t)
    b_fc_pad = jnp.zeros((1, o_pad), jnp.float32).at[:, :O].set(b_fc)
    y = _proj_bias(h_all.reshape(T * B, H), w_fc_pad, b_fc_pad)  # (T*B, o_pad)

    # PyTorch convention: output (B, T, O) -> reshape(B*T, O).
    logits = jnp.transpose(
        y[:, :O].reshape(T, B, O), (1, 0, 2)
    ).reshape(B * T, O)

    return logits, (h_n[None], c_n[None])


def init_params(key, input_size, hidden_size, output_size):
    """Deterministic parameter init mirroring the PyTorch layer shapes."""
    H = hidden_size
    k = 1.0 / jnp.sqrt(jnp.float32(H))
    keys = jax.random.split(key, 7)
    emb = jax.random.normal(keys[0], (input_size, H), jnp.float32)
    w_ih = jax.random.uniform(keys[1], (4 * H, H), jnp.float32, -k, k)
    w_hh = jax.random.uniform(keys[2], (4 * H, H), jnp.float32, -k, k)
    b_ih = jax.random.uniform(keys[3], (4 * H,), jnp.float32, -k, k)
    b_hh = jax.random.uniform(keys[4], (4 * H,), jnp.float32, -k, k)
    w_fc = jax.random.uniform(keys[5], (output_size, H), jnp.float32, -k, k)
    b_fc = jax.random.uniform(keys[6], (output_size,), jnp.float32, -k, k)
    return {
        "embedding": emb,
        "w_ih_t": w_ih.T,                       # (H, 4H)
        "w_hh_t": w_hh.T,                       # (H, 4H)
        "b": (b_ih + b_hh)[None, :],            # (1, 4H)
        "w_fc_t": w_fc.T,                       # (H, O)
        "b_fc": b_fc[None, :],                  # (1, O)
    }


if __name__ == "__main__":
    input_size = 50     # vocab size
    hidden_size = 32
    output_size = 50
    n_layers = 1
    batch = 2
    seq = 8

    key = jax.random.PRNGKey(0)
    kp, kt = jax.random.split(key)
    params = init_params(kp, input_size, hidden_size, output_size)

    tokens = jax.random.randint(kt, (batch, seq), 0, input_size, jnp.int32)
    hidden0 = (
        jnp.zeros((n_layers, batch, hidden_size), jnp.float32),
        jnp.zeros((n_layers, batch, hidden_size), jnp.float32),
    )

    logits, (h_n, c_n) = char_lstm_forward(tokens, hidden0, params)
    jax.block_until_ready((logits, h_n, c_n))

    assert logits.shape == (batch * seq, output_size)
    assert h_n.shape == (n_layers, batch, hidden_size)
    assert c_n.shape == (n_layers, batch, hidden_size)
    print("KERNEL_OK")
</pallas_src>

<mosaic_0001>
module attributes {stable_mosaic.version = 11 : i64} {
  func.func @_proj_bias_kernel(%arg0: memref<16x32xf32, #tpu.memory_space<vmem>>, %arg1: memref<32x128xf32, #tpu.memory_space<vmem>>, %arg2: memref<1x128xf32, #tpu.memory_space<vmem>>, %arg3: memref<16x128xf32, #tpu.memory_space<vmem>>) attributes {dimension_semantics = [], scalar_prefetch = 0 : i64, scratch_operands = 0 : i64, tpu.core_type = #tpu.core_type<tc>} {
    %c0 = arith.constant 0 : index
    %c0_0 = arith.constant 0 : index
    %0 = vector.load %arg0[%c0, %c0_0] : memref<16x32xf32, #tpu.memory_space<vmem>>, vector<16x32xf32>
    %c0_1 = arith.constant 0 : index
    %c0_2 = arith.constant 0 : index
    %1 = vector.load %arg1[%c0_1, %c0_2] : memref<32x128xf32, #tpu.memory_space<vmem>>, vector<32x128xf32>
    %cst = arith.constant dense<0.000000e+00> : vector<16x128xf32>
    %2 = tpu.matmul %0, %1, %cst {dimension_numbers = #tpu.dot_dimension_numbers<[1], [0], [0], [1], [0, 0, 1, 1], [], []>} : vector<16x32xf32>, vector<32x128xf32>, vector<16x128xf32> -> vector<16x128xf32>
    %c0_3 = arith.constant 0 : index
    %c0_4 = arith.constant 0 : index
    %3 = vector.load %arg2[%c0_3, %c0_4] : memref<1x128xf32, #tpu.memory_space<vmem>>, vector<1x128xf32>
    %4 = vector.broadcast %3 : vector<1x128xf32> to vector<16x128xf32>
    %5 = arith.addf %2, %4 : vector<16x128xf32>
    %c0_5 = arith.constant 0 : index
    %c0_6 = arith.constant 0 : index
    %6 = vector.load %arg3[%c0_5, %c0_6] : memref<16x128xf32, #tpu.memory_space<vmem>>, vector<16x128xf32>
    tpu.vector_store %arg3[%c0_5, %c0_6], %5 {strides = array<i32>} : memref<16x128xf32, #tpu.memory_space<vmem>>, vector<16x128xf32>,
    return
  }
}

module attributes {stable_mosaic.version = 11 : i64} {
  func.func @_lstm_recurrence_kernel(%arg0: memref<8x2x128xf32, #tpu.memory_space<vmem>>, %arg1: memref<32x128xf32, #tpu.memory_space<vmem>>, %arg2: memref<2x32xf32, #tpu.memory_space<vmem>>, %arg3: memref<2x32xf32, #tpu.memory_space<vmem>>, %arg4: memref<8x2x32xf32, #tpu.memory_space<vmem>>, %arg5: memref<2x32xf32, #tpu.memory_space<vmem>>, %arg6: memref<2x32xf32, #tpu.memory_space<vmem>>) attributes {dimension_semantics = [], scalar_prefetch = 0 : i64, scratch_operands = 0 : i64, tpu.core_type = #tpu.core_type<tc>} {
    %c0 = arith.constant 0 : index
    %c0_0 = arith.constant 0 : index
    %0 = vector.load %arg1[%c0, %c0_0] : memref<32x128xf32, #tpu.memory_space<vmem>>, vector<32x128xf32>
    %c0_1 = arith.constant 0 : index
    %c0_2 = arith.constant 0 : index
    %1 = vector.load %arg2[%c0_1, %c0_2] : memref<2x32xf32, #tpu.memory_space<vmem>>, vector<2x32xf32>
    %c0_3 = arith.constant 0 : index
    %c0_4 = arith.constant 0 : index
    %2 = vector.load %arg3[%c0_3, %c0_4] : memref<2x32xf32, #tpu.memory_space<vmem>>, vector<2x32xf32>
    %c0_i32 = arith.constant 0 : i32
    %3 = arith.index_cast %c0_i32 : i32 to index
    %c0_5 = arith.constant 0 : index
    %c0_6 = arith.constant 0 : index
    %4 = vector.load %arg0[%3, %c0_5, %c0_6] : memref<8x2x128xf32, #tpu.memory_space<vmem>>, vector<1x2x128xf32>
    %5 = vector.shape_cast %4 : vector<1x2x128xf32> to vector<2x128xf32>
    %cst = arith.constant dense<0.000000e+00> : vector<2x128xf32>
    %6 = tpu.matmul %1, %0, %cst {dimension_numbers = #tpu.dot_dimension_numbers<[1], [0], [0], [1], [0, 0, 1, 1], [], []>} : vector<2x32xf32>, vector<32x128xf32>, vector<2x128xf32> -> vector<2x128xf32>
    %7 = arith.addf %5, %6 : vector<2x128xf32>
    %8 = vector.extract_strided_slice %7 {offsets = [0, 0], sizes = [2, 32], strides = [1, 1]} : vector<2x128xf32> to vector<2x32xf32>
    %9 = arith.negf %8 : vector<2x32xf32>
    %10 = math.exp %9 : vector<2x32xf32>
    %cst_7 = arith.constant 1.000000e+00 : f32
    %11 = vector.broadcast %cst_7 : f32 to vector<2x32xf32>
    %12 = arith.addf %11, %10 : vector<2x32xf32>
    %13 = arith.divf %11, %12 : vector<2x32xf32>
    %14 = vector.extract_strided_slice %7 {offsets = [0, 32], sizes = [2, 32], strides = [1, 1]} : vector<2x128xf32> to vector<2x32xf32>
    %15 = arith.negf %14 : vector<2x32xf32>
    %16 = math.exp %15 : vector<2x32xf32>
    %cst_8 = arith.constant 1.000000e+00 : f32
    %17 = vector.broadcast %cst_8 : f32 to vector<2x32xf32>
    %18 = arith.addf %17, %16 : vector<2x32xf32>
    %19 = arith.divf %17, %18 : vector<2x32xf32>
    %20 = vector.extract_strided_slice %7 {offsets = [0, 64], sizes = [2, 32], strides = [1, 1]} : vector<2x128xf32> to vector<2x32xf32>
    %21 = math.tanh %20 : vector<2x32xf32>
    %22 = vector.extract_strided_slice %7 {offsets = [0, 96], sizes = [2, 32], strides = [1, 1]} : vector<2x128xf32> to vector<2x32xf32>
    %23 = arith.negf %22 : vector<2x32xf32>
    %24 = math.exp %23 : vector<2x32xf32>
    %cst_9 = arith.constant 1.000000e+00 : f32
    %25 = vector.broadcast %cst_9 : f32 to vector<2x32xf32>
    %26 = arith.addf %25, %24 : vector<2x32xf32>
    %27 = arith.divf %25, %26 : vector<2x32xf32>
    %28 = arith.mulf %19, %2 : vector<2x32xf32>
    %29 = arith.mulf %13, %21 : vector<2x32xf32>
    %30 = arith.addf %28, %29 : vector<2x32xf32>
    %31 = math.tanh %30 : vector<2x32xf32>
    %32 = arith.mulf %27, %31 : vector<2x32xf32>
    %33 = arith.index_cast %c0_i32 : i32 to index
    %c0_10 = arith.constant 0 : index
    %c0_11 = arith.constant 0 : index
    %34 = vector.load %arg4[%33, %c0_10, %c0_11] : memref<8x2x32xf32, #tpu.memory_space<vmem>>, vector<1x2x32xf32>
    %35 = vector.shape_cast %34 : vector<1x2x32xf32> to vector<2x32xf32>
    %36 = vector.shape_cast %32 : vector<2x32xf32> to vector<1x2x32xf32>
    tpu.vector_store %arg4[%33, %c0_10, %c0_11], %36 {strides = array<i32>} : memref<8x2x32xf32, #tpu.memory_space<vmem>>, vector<1x2x32xf32>,
    %c1_i32 = arith.constant 1 : i32
    %37 = arith.index_cast %c1_i32 : i32 to index
    %c0_12 = arith.constant 0 : index
    %c0_13 = arith.constant 0 : index
    %38 = vector.load %arg0[%37, %c0_12, %c0_13] : memref<8x2x128xf32, #tpu.memory_space<vmem>>, vector<1x2x128xf32>
    %39 = vector.shape_cast %38 : vector<1x2x128xf32> to vector<2x128xf32>
    %cst_14 = arith.constant dense<0.000000e+00> : vector<2x128xf32>
    %40 = tpu.matmul %32, %0, %cst_14 {dimension_numbers = #tpu.dot_dimension_numbers<[1], [0], [0], [1], [0, 0, 1, 1], [], []>} : vector<2x32xf32>, vector<32x128xf32>, vector<2x128xf32> -> vector<2x128xf32>
    %41 = arith.addf %39, %40 : vector<2x128xf32>
    %42 = vector.extract_strided_slice %41 {offsets = [0, 0], sizes = [2, 32], strides = [1, 1]} : vector<2x128xf32> to vector<2x32xf32>
    %43 = arith.negf %42 : vector<2x32xf32>
    %44 = math.exp %43 : vector<2x32xf32>
    %cst_15 = arith.constant 1.000000e+00 : f32
    %45 = vector.broadcast %cst_15 : f32 to vector<2x32xf32>
    %46 = arith.addf %45, %44 : vector<2x32xf32>
    %47 = arith.divf %45, %46 : vector<2x32xf32>
    %48 = vector.extract_strided_slice %41 {offsets = [0, 32], sizes = [2, 32], strides = [1, 1]} : vector<2x128xf32> to vector<2x32xf32>
    %49 = arith.negf %48 : vector<2x32xf32>
    %50 = math.exp %49 : vector<2x32xf32>
    %cst_16 = arith.constant 1.000000e+00 : f32
    %51 = vector.broadcast %cst_16 : f32 to vector<2x32xf32>
    %52 = arith.addf %51, %50 : vector<2x32xf32>
    %53 = arith.divf %51, %52 : vector<2x32xf32>
    %54 = vector.extract_strided_slice %41 {offsets = [0, 64], sizes = [2, 32], strides = [1, 1]} : vector<2x128xf32> to vector<2x32xf32>
    %55 = math.tanh %54 : vector<2x32xf32>
    %56 = vector.extract_strided_slice %41 {offsets = [0, 96], sizes = [2, 32], strides = [1, 1]} : vector<2x128xf32> to vector<2x32xf32>
    %57 = arith.negf %56 : vector<2x32xf32>
    %58 = math.exp %57 : vector<2x32xf32>
    %cst_17 = arith.constant 1.000000e+00 : f32
    %59 = vector.broadcast %cst_17 : f32 to vector<2x32xf32>
    %60 = arith.addf %59, %58 : vector<2x32xf32>
    %61 = arith.divf %59, %60 : vector<2x32xf32>
    %62 = arith.mulf %53, %30 : vector<2x32xf32>
    %63 = arith.mulf %47, %55 : vector<2x32xf32>
    %64 = arith.addf %62, %63 : vector<2x32xf32>
    %65 = math.tanh %64 : vector<2x32xf32>
    %66 = arith.mulf %61, %65 : vector<2x32xf32>
    %67 = arith.index_cast %c1_i32 : i32 to index
    %c0_18 = arith.constant 0 : index
    %c0_19 = arith.constant 0 : index
    %68 = vector.load %arg4[%67, %c0_18, %c0_19] : memref<8x2x32xf32, #tpu.memory_space<vmem>>, vector<1x2x32xf32>
    %69 = vector.shape_cast %68 : vector<1x2x32xf32> to vector<2x32xf32>
    %70 = vector.shape_cast %66 : vector<2x32xf32> to vector<1x2x32xf32>
    tpu.vector_store %arg4[%67, %c0_18, %c0_19], %70 {strides = array<i32>} : memref<8x2x32xf32, #tpu.memory_space<vmem>>, vector<1x2x32xf32>,
    %c2_i32 = arith.constant 2 : i32
    %71 = arith.index_cast %c2_i32 : i32 to index
    %c0_20 = arith.constant 0 : index
    %c0_21 = arith.constant 0 : index
    %72 = vector.load %arg0[%71, %c0_20, %c0_21] : memref<8x2x128xf32, #tpu.memory_space<vmem>>, vector<1x2x128xf32>
    %73 = vector.shape_cast %72 : vector<1x2x128xf32> to vector<2x128xf32>
    %cst_22 = arith.constant dense<0.000000e+00> : vector<2x128xf32>
    %74 = tpu.matmul %66, %0, %cst_22 {dimension_numbers = #tpu.dot_dimension_numbers<[1], [0], [0], [1], [0, 0, 1, 1], [], []>} : vector<2x32xf32>, vector<32x128xf32>, vector<2x128xf32> -> vector<2x128xf32>
    %75 = arith.addf %73, %74 : vector<2x128xf32>
    %76 = vector.extract_strided_slice %75 {offsets = [0, 0], sizes = [2, 32], strides = [1, 1]} : vector<2x128xf32> to vector<2x32xf32>
    %77 = arith.negf %76 : vector<2x32xf32>
    %78 = math.exp %77 : vector<2x32xf32>
    %cst_23 = arith.constant 1.000000e+00 : f32
    %79 = vector.broadcast %cst_23 : f32 to vector<2x32xf32>
    %80 = arith.addf %79, %78 : vector<2x32xf32>
    %81 = arith.divf %79, %80 : vector<2x32xf32>
    %82 = vector.extract_strided_slice %75 {offsets = [0, 32], sizes = [2, 32], strides = [1, 1]} : vector<2x128xf32> to vector<2x32xf32>
    %83 = arith.negf %82 : vector<2x32xf32>
    %84 = math.exp %83 : vector<2x32xf32>
    %cst_24 = arith.constant 1.000000e+00 : f32
    %85 = vector.broadcast %cst_24 : f32 to vector<2x32xf32>
    %86 = arith.addf %85, %84 : vector<2x32xf32>
    %87 = arith.divf %85, %86 : vector<2x32xf32>
    %88 = vector.extract_strided_slice %75 {offsets = [0, 64], sizes = [2, 32], strides = [1, 1]} : vector<2x128xf32> to vector<2x32xf32>
    %89 = math.tanh %88 : vector<2x32xf32>
    %90 = vector.extract_strided_slice %75 {offsets = [0, 96], sizes = [2, 32], strides = [1, 1]} : vector<2x128xf32> to vector<2x32xf32>
    %91 = arith.negf %90 : vector<2x32xf32>
    %92 = math.exp %91 : vector<2x32xf32>
    %cst_25 = arith.constant 1.000000e+00 : f32
    %93 = vector.broadcast %cst_25 : f32 to vector<2x32xf32>
    %94 = arith.addf %93, %92 : vector<2x32xf32>
    %95 = arith.divf %93, %94 : vector<2x32xf32>
    %96 = arith.mulf %87, %64 : vector<2x32xf32>
    %97 = arith.mulf %81, %89 : vector<2x32xf32>
    %98 = arith.addf %96, %97 : vector<2x32xf32>
    %99 = math.tanh %98 : vector<2x32xf32>
    %100 = arith.mulf %95, %99 : vector<2x32xf32>
    %101 = arith.index_cast %c2_i32 : i32 to index
    %c0_26 = arith.constant 0 : index
    %c0_27 = arith.constant 0 : index
    %102 = vector.load %arg4[%101, %c0_26, %c0_27] : memref<8x2x32xf32, #tpu.memory_space<vmem>>, vector<1x2x32xf32>
    %103 = vector.shape_cast %102 : vector<1x2x32xf32> to vector<2x32xf32>
    %104 = vector.shape_cast %100 : vector<2x32xf32> to vector<1x2x32xf32>
    tpu.vector_store %arg4[%101, %c0_26, %c0_27], %104 {strides = array<i32>} : memref<8x2x32xf32, #tpu.memory_space<vmem>>, vector<1x2x32xf32>,
    %c3_i32 = arith.constant 3 : i32
    %105 = arith.index_cast %c3_i32 : i32 to index
    %c0_28 = arith.constant 0 : index
    %c0_29 = arith.constant 0 : index
    %106 = vector.load %arg0[%105, %c0_28, %c0_29] : memref<8x2x128xf32, #tpu.memory_space<vmem>>, vector<1x2x128xf32>
    %107 = vector.shape_cast %106 : vector<1x2x128xf32> to vector<2x128xf32>
    %cst_30 = arith.constant dense<0.000000e+00> : vector<2x128xf32>
    %108 = tpu.matmul %100, %0, %cst_30 {dimension_numbers = #tpu.dot_dimension_numbers<[1], [0], [0], [1], [0, 0, 1, 1], [], []>} : vector<2x32xf32>, vector<32x128xf32>, vector<2x128xf32> -> vector<2x128xf32>
    %109 = arith.addf %107, %108 : vector<2x128xf32>
    %110 = vector.extract_strided_slice %109 {offsets = [0, 0], sizes = [2, 32], strides = [1, 1]} : vector<2x128xf32> to vector<2x32xf32>
    %111 = arith.negf %110 : vector<2x32xf32>
    %112 = math.exp %111 : vector<2x32xf32>
    %cst_31 = arith.constant 1.000000e+00 : f32
    %113 = vector.broadcast %cst_31 : f32 to vector<2x32xf32>
    %114 = arith.addf %113, %112 : vector<2x32xf32>
    %115 = arith.divf %113, %114 : vector<2x32xf32>
    %116 = vector.extract_strided_slice %109 {offsets = [0, 32], sizes = [2, 32], strides = [1, 1]} : vector<2x128xf32> to vector<2x32xf32>
    %117 = arith.negf %116 : vector<2x32xf32>
    %118 = math.exp %117 : vector<2x32xf32>
    %cst_32 = arith.constant 1.000000e+00 : f32
    %119 = vector.broadcast %cst_32 : f32 to vector<2x32xf32>
    %120 = arith.addf %119, %118 : vector<2x32xf32>
    %121 = arith.divf %119, %120 : vector<2x32xf32>
    %122 = vector.extract_strided_slice %109 {offsets = [0, 64], sizes = [2, 32], strides = [1, 1]} : vector<2x128xf32> to vector<2x32xf32>
    %123 = math.tanh %122 : vector<2x32xf32>
    %124 = vector.extract_strided_slice %109 {offsets = [0, 96], sizes = [2, 32], strides = [1, 1]} : vector<2x128xf32> to vector<2x32xf32>
    %125 = arith.negf %124 : vector<2x32xf32>
    %126 = math.exp %125 : vector<2x32xf32>
    %cst_33 = arith.constant 1.000000e+00 : f32
    %127 = vector.broadcast %cst_33 : f32 to vector<2x32xf32>
    %128 = arith.addf %127, %126 : vector<2x32xf32>
    %129 = arith.divf %127, %128 : vector<2x32xf32>
    %130 = arith.mulf %121, %98 : vector<2x32xf32>
    %131 = arith.mulf %115, %123 : vector<2x32xf32>
    %132 = arith.addf %130, %131 : vector<2x32xf32>
    %133 = math.tanh %132 : vector<2x32xf32>
    %134 = arith.mulf %129, %133 : vector<2x32xf32>
    %135 = arith.index_cast %c3_i32 : i32 to index
    %c0_34 = arith.constant 0 : index
    %c0_35 = arith.constant 0 : index
    %136 = vector.load %arg4[%135, %c0_34, %c0_35] : memref<8x2x32xf32, #tpu.memory_space<vmem>>, vector<1x2x32xf32>
    %137 = vector.shape_cast %136 : vector<1x2x32xf32> to vector<2x32xf32>
    %138 = vector.shape_cast %134 : vector<2x32xf32> to vector<1x2x32xf32>
    tpu.vector_store %arg4[%135, %c0_34, %c0_35], %138 {strides = array<i32>} : memref<8x2x32xf32, #tpu.memory_space<vmem>>, vector<1x2x32xf32>,
    %c4_i32 = arith.constant 4 : i32
    %139 = arith.index_cast %c4_i32 : i32 to index
    %c0_36 = arith.constant 0 : index
    %c0_37 = arith.constant 0 : index
    %140 = vector.load %arg0[%139, %c0_36, %c0_37] : memref<8x2x128xf32, #tpu.memory_space<vmem>>, vector<1x2x128xf32>
    %141 = vector.shape_cast %140 : vector<1x2x128xf32> to vector<2x128xf32>
    %cst_38 = arith.constant dense<0.000000e+00> : vector<2x128xf32>
    %142 = tpu.matmul %134, %0, %cst_38 {dimension_numbers = #tpu.dot_dimension_numbers<[1], [0], [0], [1], [0, 0, 1, 1], [], []>} : vector<2x32xf32>, vector<32x128xf32>, vector<2x128xf32> -> vector<2x128xf32>
    %143 = arith.addf %141, %142 : vector<2x128xf32>
    %144 = vector.extract_strided_slice %143 {offsets = [0, 0], sizes = [2, 32], strides = [1, 1]} : vector<2x128xf32> to vector<2x32xf32>
    %145 = arith.negf %144 : vector<2x32xf32>
    %146 = math.exp %145 : vector<2x32xf32>
    %cst_39 = arith.constant 1.000000e+00 : f32
    %147 = vector.broadcast %cst_39 : f32 to vector<2x32xf32>
    %148 = arith.addf %147, %146 : vector<2x32xf32>
    %149 = arith.divf %147, %148 : vector<2x32xf32>
    %150 = vector.extract_strided_slice %143 {offsets = [0, 32], sizes = [2, 32], strides = [1, 1]} : vector<2x128xf32> to vector<2x32xf32>
    %151 = arith.negf %150 : vector<2x32xf32>
    %152 = math.exp %151 : vector<2x32xf32>
    %cst_40 = arith.constant 1.000000e+00 : f32
    %153 = vector.broadcast %cst_40 : f32 to vector<2x32xf32>
    %154 = arith.addf %153, %152 : vector<2x32xf32>
    %155 = arith.divf %153, %154 : vector<2x32xf32>
    %156 = vector.extract_strided_slice %143 {offsets = [0, 64], sizes = [2, 32], strides = [1, 1]} : vector<2x128xf32> to vector<2x32xf32>
    %157 = math.tanh %156 : vector<2x32xf32>
    %158 = vector.extract_strided_slice %143 {offsets = [0, 96], sizes = [2, 32], strides = [1, 1]} : vector<2x128xf32> to vector<2x32xf32>
    %159 = arith.negf %158 : vector<2x32xf32>
    %160 = math.exp %159 : vector<2x32xf32>
    %cst_41 = arith.constant 1.000000e+00 : f32
    %161 = vector.broadcast %cst_41 : f32 to vector<2x32xf32>
    %162 = arith.addf %161, %160 : vector<2x32xf32>
    %163 = arith.divf %161, %162 : vector<2x32xf32>
    %164 = arith.mulf %155, %132 : vector<2x32xf32>
    %165 = arith.mulf %149, %157 : vector<2x32xf32>
    %166 = arith.addf %164, %165 : vector<2x32xf32>
    %167 = math.tanh %166 : vector<2x32xf32>
    %168 = arith.mulf %163, %167 : vector<2x32xf32>
    %169 = arith.index_cast %c4_i32 : i32 to index
    %c0_42 = arith.constant 0 : index
    %c0_43 = arith.constant 0 : index
    %170 = vector.load %arg4[%169, %c0_42, %c0_43] : memref<8x2x32xf32, #tpu.memory_space<vmem>>, vector<1x2x32xf32>
    %171 = vector.shape_cast %170 : vector<1x2x32xf32> to vector<2x32xf32>
    %172 = vector.shape_cast %168 : vector<2x32xf32> to vector<1x2x32xf32>
    tpu.vector_store %arg4[%169, %c0_42, %c0_43], %172 {strides = array<i32>} : memref<8x2x32xf32, #tpu.memory_space<vmem>>, vector<1x2x32xf32>,
    %c5_i32 = arith.constant 5 : i32
    %173 = arith.index_cast %c5_i32 : i32 to index
    %c0_44 = arith.constant 0 : index
    %c0_45 = arith.constant 0 : index
    %174 = vector.load %arg0[%173, %c0_44, %c0_45] : memref<8x2x128xf32, #tpu.memory_space<vmem>>, vector<1x2x128xf32>
    %175 = vector.shape_cast %174 : vector<1x2x128xf32> to vector<2x128xf32>
    %cst_46 = arith.constant dense<0.000000e+00> : vector<2x128xf32>
    %176 = tpu.matmul %168, %0, %cst_46 {dimension_numbers = #tpu.dot_dimension_numbers<[1], [0], [0], [1], [0, 0, 1, 1], [], []>} : vector<2x32xf32>, vector<32x128xf32>, vector<2x128xf32> -> vector<2x128xf32>
    %177 = arith.addf %175, %176 : vector<2x128xf32>
    %178 = vector.extract_strided_slice %177 {offsets = [0, 0], sizes = [2, 32], strides = [1, 1]} : vector<2x128xf32> to vector<2x32xf32>
    %179 = arith.negf %178 : vector<2x32xf32>
    %180 = math.exp %179 : vector<2x32xf32>
    %cst_47 = arith.constant 1.000000e+00 : f32
    %181 = vector.broadcast %cst_47 : f32 to vector<2x32xf32>
    %182 = arith.addf %181, %180 : vector<2x32xf32>
    %183 = arith.divf %181, %182 : vector<2x32xf32>
    %184 = vector.extract_strided_slice %177 {offsets = [0, 32], sizes = [2, 32], strides = [1, 1]} : vector<2x128xf32> to vector<2x32xf32>
    %185 = arith.negf %184 : vector<2x32xf32>
    %186 = math.exp %185 : vector<2x32xf32>
    %cst_48 = arith.constant 1.000000e+00 : f32
    %187 = vector.broadcast %cst_48 : f32 to vector<2x32xf32>
    %188 = arith.addf %187, %186 : vector<2x32xf32>
    %189 = arith.divf %187, %188 : vector<2x32xf32>
    %190 = vector.extract_strided_slice %177 {offsets = [0, 64], sizes = [2, 32], strides = [1, 1]} : vector<2x128xf32> to vector<2x32xf32>
    %191 = math.tanh %190 : vector<2x32xf32>
    %192 = vector.extract_strided_slice %177 {offsets = [0, 96], sizes = [2, 32], strides = [1, 1]} : vector<2x128xf32> to vector<2x32xf32>
    %193 = arith.negf %192 : vector<2x32xf32>
    %194 = math.exp %193 : vector<2x32xf32>
    %cst_49 = arith.constant 1.000000e+00 : f32
    %195 = vector.broadcast %cst_49 : f32 to vector<2x32xf32>
    %196 = arith.addf %195, %194 : vector<2x32xf32>
    %197 = arith.divf %195, %196 : vector<2x32xf32>
    %198 = arith.mulf %189, %166 : vector<2x32xf32>
    %199 = arith.mulf %183, %191 : vector<2x32xf32>
    %200 = arith.addf %198, %199 : vector<2x32xf32>
    %201 = math.tanh %200 : vector<2x32xf32>
    %202 = arith.mulf %197, %201 : vector<2x32xf32>
    %203 = arith.index_cast %c5_i32 : i32 to index
    %c0_50 = arith.constant 0 : index
    %c0_51 = arith.constant 0 : index
    %204 = vector.load %arg4[%203, %c0_50, %c0_51] : memref<8x2x32xf32, #tpu.memory_space<vmem>>, vector<1x2x32xf32>
    %205 = vector.shape_cast %204 : vector<1x2x32xf32> to vector<2x32xf32>
    %206 = vector.shape_cast %202 : vector<2x32xf32> to vector<1x2x32xf32>
    tpu.vector_store %arg4[%203, %c0_50, %c0_51], %206 {strides = array<i32>} : memref<8x2x32xf32, #tpu.memory_space<vmem>>, vector<1x2x32xf32>,
    %c6_i32 = arith.constant 6 : i32
    %207 = arith.index_cast %c6_i32 : i32 to index
    %c0_52 = arith.constant 0 : index
    %c0_53 = arith.constant 0 : index
    %208 = vector.load %arg0[%207, %c0_52, %c0_53] : memref<8x2x128xf32, #tpu.memory_space<vmem>>, vector<1x2x128xf32>
    %209 = vector.shape_cast %208 : vector<1x2x128xf32> to vector<2x128xf32>
    %cst_54 = arith.constant dense<0.000000e+00> : vector<2x128xf32>
    %210 = tpu.matmul %202, %0, %cst_54 {dimension_numbers = #tpu.dot_dimension_numbers<[1], [0], [0], [1], [0, 0, 1, 1], [], []>} : vector<2x32xf32>, vector<32x128xf32>, vector<2x128xf32> -> vector<2x128xf32>
    %211 = arith.addf %209, %210 : vector<2x128xf32>
    %212 = vector.extract_strided_slice %211 {offsets = [0, 0], sizes = [2, 32], strides = [1, 1]} : vector<2x128xf32> to vector<2x32xf32>
    %213 = arith.negf %212 : vector<2x32xf32>
    %214 = math.exp %213 : vector<2x32xf32>
    %cst_55 = arith.constant 1.000000e+00 : f32
    %215 = vector.broadcast %cst_55 : f32 to vector<2x32xf32>
    %216 = arith.addf %215, %214 : vector<2x32xf32>
    %217 = arith.divf %215, %216 : vector<2x32xf32>
    %218 = vector.extract_strided_slice %211 {offsets = [0, 32], sizes = [2, 32], strides = [1, 1]} : vector<2x128xf32> to vector<2x32xf32>
    %219 = arith.negf %218 : vector<2x32xf32>
    %220 = math.exp %219 : vector<2x32xf32>
    %cst_56 = arith.constant 1.000000e+00 : f32
    %221 = vector.broadcast %cst_56 : f32 to vector<2x32xf32>
    %222 = arith.addf %221, %220 : vector<2x32xf32>
    %223 = arith.divf %221, %222 : vector<2x32xf32>
    %224 = vector.extract_strided_slice %211 {offsets = [0, 64], sizes = [2, 32], strides = [1, 1]} : vector<2x128xf32> to vector<2x32xf32>
    %225 = math.tanh %224 : vector<2x32xf32>
    %226 = vector.extract_strided_slice %211 {offsets = [0, 96], sizes = [2, 32], strides = [1, 1]} : vector<2x128xf32> to vector<2x32xf32>
    %227 = arith.negf %226 : vector<2x32xf32>
    %228 = math.exp %227 : vector<2x32xf32>
    %cst_57 = arith.constant 1.000000e+00 : f32
    %229 = vector.broadcast %cst_57 : f32 to vector<2x32xf32>
    %230 = arith.addf %229, %228 : vector<2x32xf32>
    %231 = arith.divf %229, %230 : vector<2x32xf32>
    %232 = arith.mulf %223, %200 : vector<2x32xf32>
    %233 = arith.mulf %217, %225 : vector<2x32xf32>
    %234 = arith.addf %232, %233 : vector<2x32xf32>
    %235 = math.tanh %234 : vector<2x32xf32>
    %236 = arith.mulf %231, %235 : vector<2x32xf32>
    %237 = arith.index_cast %c6_i32 : i32 to index
    %c0_58 = arith.constant 0 : index
    %c0_59 = arith.constant 0 : index
    %238 = vector.load %arg4[%237, %c0_58, %c0_59] : memref<8x2x32xf32, #tpu.memory_space<vmem>>, vector<1x2x32xf32>
    %239 = vector.shape_cast %238 : vector<1x2x32xf32> to vector<2x32xf32>
    %240 = vector.shape_cast %236 : vector<2x32xf32> to vector<1x2x32xf32>
    tpu.vector_store %arg4[%237, %c0_58, %c0_59], %240 {strides = array<i32>} : memref<8x2x32xf32, #tpu.memory_space<vmem>>, vector<1x2x32xf32>,
    %c7_i32 = arith.constant 7 : i32
    %241 = arith.index_cast %c7_i32 : i32 to index
    %c0_60 = arith.constant 0 : index
    %c0_61 = arith.constant 0 : index
    %242 = vector.load %arg0[%241, %c0_60, %c0_61] : memref<8x2x128xf32, #tpu.memory_space<vmem>>, vector<1x2x128xf32>
    %243 = vector.shape_cast %242 : vector<1x2x128xf32> to vector<2x128xf32>
    %cst_62 = arith.constant dense<0.000000e+00> : vector<2x128xf32>
    %244 = tpu.matmul %236, %0, %cst_62 {dimension_numbers = #tpu.dot_dimension_numbers<[1], [0], [0], [1], [0, 0, 1, 1], [], []>} : vector<2x32xf32>, vector<32x128xf32>, vector<2x128xf32> -> vector<2x128xf32>
    %245 = arith.addf %243, %244 : vector<2x128xf32>
    %246 = vector.extract_strided_slice %245 {offsets = [0, 0], sizes = [2, 32], strides = [1, 1]} : vector<2x128xf32> to vector<2x32xf32>
    %247 = arith.negf %246 : vector<2x32xf32>
    %248 = math.exp %247 : vector<2x32xf32>
    %cst_63 = arith.constant 1.000000e+00 : f32
    %249 = vector.broadcast %cst_63 : f32 to vector<2x32xf32>
    %250 = arith.addf %249, %248 : vector<2x32xf32>
    %251 = arith.divf %249, %250 : vector<2x32xf32>
    %252 = vector.extract_strided_slice %245 {offsets = [0, 32], sizes = [2, 32], strides = [1, 1]} : vector<2x128xf32> to vector<2x32xf32>
    %253 = arith.negf %252 : vector<2x32xf32>
    %254 = math.exp %253 : vector<2x32xf32>
    %cst_64 = arith.constant 1.000000e+00 : f32
    %255 = vector.broadcast %cst_64 : f32 to vector<2x32xf32>
    %256 = arith.addf %255, %254 : vector<2x32xf32>
    %257 = arith.divf %255, %256 : vector<2x32xf32>
    %258 = vector.extract_strided_slice %245 {offsets = [0, 64], sizes = [2, 32], strides = [1, 1]} : vector<2x128xf32> to vector<2x32xf32>
    %259 = math.tanh %258 : vector<2x32xf32>
    %260 = vector.extract_strided_slice %245 {offsets = [0, 96], sizes = [2, 32], strides = [1, 1]} : vector<2x128xf32> to vector<2x32xf32>
    %261 = arith.negf %260 : vector<2x32xf32>
    %262 = math.exp %261 : vector<2x32xf32>
    %cst_65 = arith.constant 1.000000e+00 : f32
    %263 = vector.broadcast %cst_65 : f32 to vector<2x32xf32>
    %264 = arith.addf %263, %262 : vector<2x32xf32>
    %265 = arith.divf %263, %264 : vector<2x32xf32>
    %266 = arith.mulf %257, %234 : vector<2x32xf32>
    %267 = arith.mulf %251, %259 : vector<2x32xf32>
    %268 = arith.addf %266, %267 : vector<2x32xf32>
    %269 = math.tanh %268 : vector<2x32xf32>
    %270 = arith.mulf %265, %269 : vector<2x32xf32>
    %271 = arith.index_cast %c7_i32 : i32 to index
    %c0_66 = arith.constant 0 : index
    %c0_67 = arith.constant 0 : index
    %272 = vector.load %arg4[%271, %c0_66, %c0_67] : memref<8x2x32xf32, #tpu.memory_space<vmem>>, vector<1x2x32xf32>
    %273 = vector.shape_cast %272 : vector<1x2x32xf32> to vector<2x32xf32>
    %274 = vector.shape_cast %270 : vector<2x32xf32> to vector<1x2x32xf32>
    tpu.vector_store %arg4[%271, %c0_66, %c0_67], %274 {strides = array<i32>} : memref<8x2x32xf32, #tpu.memory_space<vmem>>, vector<1x2x32xf32>,
    %c8_i32 = arith.constant 8 : i32
    %c0_68 = arith.constant 0 : index
    %c0_69 = arith.constant 0 : index
    %275 = vector.load %arg5[%c0_68, %c0_69] : memref<2x32xf32, #tpu.memory_space<vmem>>, vector<2x32xf32>
    tpu.vector_store %arg5[%c0_68, %c0_69], %270 {strides = array<i32>} : memref<2x32xf32, #tpu.memory_space<vmem>>, vector<2x32xf32>,
    %c0_70 = arith.constant 0 : index
    %c0_71 = arith.constant 0 : index
    %276 = vector.load %arg6[%c0_70, %c0_71] : memref<2x32xf32, #tpu.memory_space<vmem>>, vector<2x32xf32>
    tpu.vector_store %arg6[%c0_70, %c0_71], %268 {strides = array<i32>} : memref<2x32xf32, #tpu.memory_space<vmem>>, vector<2x32xf32>,
    return
  }
}

</mosaic_0001>

<bundles_post_ra>
// kernel: char_lstm_forward.3
= control target key start
LH: loop header
LB: loop body
LE: loop exit
PB: predicated region body
PF: predicated region fallthrough
CT: control target
= control target key end

     0   :  { %vm27_vm0 = vcmask 261120   ;;  %s190_s1 = inlined_call_operand.vmem [shape: f32[32,128], index: 1, kind: input, shape index: {}]   ;;  %s191_s0 = inlined_call_operand.vmem [shape: f32[16,32], index: 0, kind: input, shape index: {}]   ;;  %s192_s2 = inlined_call_operand.vmem [shape: f32[1,128], index: 2, kind: input, shape index: {}]   ;;  %s193_s3 = inlined_call_operand.vmem [shape: f32[16,128], index: 3, kind: output, shape index: {}]  }
   0x1   :  { %v16_v0 = vld [vmem:[%s190_s1] sm:$0xff]  ;;  %v17_v1 = vld [vmem:[%s190_s1 + $0x8] sm:$0xff]  ;;  %v18_v2 = vld [vmem:[%s190_s1 + $0x10] sm:$0xff] }
   0x2   :  { %v135_v3 = vpack.c.bf16 %v17_v1, %v16_v0  ;;  %v19_v4 = vld [vmem:[%s190_s1 + $0x18] sm:$0xff]  ;;  %v14_v5 = vld [vmem:[%s191_s0] sm:$0xff]  ;;  %v15_v7 = vld [vmem:[%s191_s0 + $0x8] sm:$0xff] }
   0x3   :  { %v139_v6 = vpack.c.bf16 %v19_v4, %v18_v2  ;;  %132 = vmatprep.mubr.msk.f32.mxu0 %vm27_vm0, %v14_v5  ;;  %v115_v8 = vld [vmem:[%s192_s2] ss:$0 sm:$0xff] }
   0x4   :  { %136 = vmatprep.subr.bf16.mxu0 %v135_v3 }
   0x5   :  { %138 = vmatpush3.bf16.msra.mxu0 %v135_v3 }
   0x6   :  { %140 = vmatprep.subr.bf16.mxu0 %v139_v6 }
   0x9   :  { %142 = vmatpush3.bf16.msra.mxu0 %v139_v6 }
   0xc   :  { %133 = vmatmul.mubr.msk.f32.vlgmr.msra.gmra.mrb[0].mxu0 %vm27_vm0, %v15_v7 }
  0xdf   :  { %v134_v9 = vpop.f32.mrb[0].mxu0 }
  0xe0   :  { %v106_v10 = vadd.f32 %v134_v9, %v115_v8  ;;  %v100_v11 = vpop.f32.mrb[1].mxu0 }
  0xe1   :  { %v101_v12 = vadd.f32 %v115_v8, %v100_v11 }
  0xe2   :  { %110 = vst [vmem:[%s193_s3 + $0x8] sm:$0xff] %v106_v10 }
  0xe3   :  { %109 = vst [vmem:[%s193_s3] sm:$0xff] %v101_v12 }

// kernel: char_lstm_forward.4
= control target key start
LH: loop header
LB: loop body
LE: loop exit
PB: predicated region body
PF: predicated region fallthrough
CT: control target
= control target key end

     0   :  { %12 = vsyncpa [#allocation3], 0  ;;  %v1237_v3 = vmov 0.0|0.0   ;;  %vm1238_vm0 = vmmov 0   ;;  %v1239_v6 = vmov 0.0   ;;  %s1473_s0 = inlined_call_operand.vmem [shape: f32[8,2,128], index: 0, kind: input, shape index: {}]   ;;  %s1474_s1 = inlined_call_operand.vmem [shape: f32[32,128], index: 1, kind: input, shape index: {}]   ;;  %s1475_s2 = inlined_call_operand.vmem [shape: f32[2,32], index: 2, kind: input, shape index: {}]   ;;  %s1476_s3 = inlined_call_operand.vmem [shape: f32[2,32], index: 3, kind: input, shape index: {}]   ;;  %s1477_s4 = inlined_call_operand.vmem [shape: f32[8,2,32], index: 4, kind: output, shape index: {0}]   ;;  %s1478_s5 = inlined_call_operand.hbm [shape: f32[2,32], index: 5, kind: output, shape index: {1}]   ;;  %s1479_s6 = inlined_call_operand.hbm [shape: f32[2,32], index: 6, kind: output, shape index: {2}]  }
   0x1   :  { %v22_v0 = vld [vmem:[%s1474_s1] sm:$0xff]  ;;  %v23_v1 = vld [vmem:[%s1474_s1 + $0x8] sm:$0xff]  ;;  %v24_v2 = vld [vmem:[%s1474_s1 + $0x10] sm:$0xff]  ;;  %1069 = vmatprep.subr.bf16.mxu0 %v1237_v3  ;;  %989 = vmatprep.mubr.msk.f32.mxu0 %vm1238_vm0, %v1239_v6 }
   0x2   :  { %v1290_v4 = vpack.c.bf16 %v23_v1, %v22_v0  ;;  %v25_v5 = vld [vmem:[%s1474_s1 + $0x18] sm:$0xff]  ;;  %1075 = vmatprep.subr.bf16.mxu1 %v1237_v3  ;;  %1000 = vmatprep.mubr.msk.f32.mxu1 %vm1238_vm0, %v1239_v6 }
   0x3   :  { %13 = vsyncpa [#allocation5], 0  ;;  %v1301_v7 = vpack.c.bf16 %v25_v5, %v24_v2  ;;  %v26_v8 = vld [vmem:[%s1475_s2] sm:$0x3]  ;;  %vm29_vm1 = vcmask 261120   ;;  %s1240_s7 = smov 64  }
   0x4   :  { %1071 = vmatpush3.bf16.msra.mxu0 %v1290_v4  ;;  %1077 = vmatpush3.bf16.msra.mxu1 %v1290_v4  ;;  %v28_v9 = vld [vmem:[%s1473_s0] sm:$0x3]  ;;  %s1241_s10 = smov 32   ;;  %vm136_vm2 = vcmask 254976   ;;  %v913_v29 = vld [vmem:[%s1473_s0 + $0x2] sm:$0x3] }
   0x5   :  { %1072 = vmatprep.subr.bf16.mxu0 %v1237_v3  ;;  %1078 = vmatprep.subr.bf16.mxu1 %v1237_v3  ;;  %v27_v14 = vld [vmem:[%s1476_s3] sm:$0x3]  ;;  %v917_v47 = vld [vmem:[%s1473_s0 + $0x4] sm:$0x3]  ;;  %v921_v1 = vld [vmem:[%s1473_s0 + $0x6] sm:$0x3] }
   0x6   :  { %s1243_s13 = smov [#allocation4]  }
   0x7   :  { %s897_s14 = sshll.u32 %s1243_s13, 4  ;;  %s898_s14 = int_to_ptr.vmem [resolvable:$true] %s897_s14 }
   0x8   :  { %1074 = vmatpush3.bf16.msra.mxu0 %v1301_v7  ;;  %1080 = vmatpush3.bf16.msra.mxu1 %v1301_v7  ;;  %s1189_s15 = scalar_lea.vmem %s898_s14, 32  ;;  %p1194_p1 = scmp.lt.s32.totalorder %s898_s14, %s898_s14 }
   0x9   :  { %1081 = vmatprep.subr.bf16.mxu0 %v1237_v3  ;;  %1087 = vmatprep.subr.bf16.mxu1 %v1237_v3  ;;  %p1190_p0 = scmp.ne.s32.totalorder %s898_s14, %s1189_s15  ;;  %p1195_p2 = scmp.lt.s32.totalorder %s1189_s15, %s1189_s15 }
   0xb   :  { %990 = vmatmul.mubr.msk.f32.vlgmr.msra.gmra.mrb[0].mxu0 %vm29_vm1, %v26_v8  ;;  %p1196_p3 = por %p1195_p2, %p1194_p1 }
   0xc   :  { %1083 = vmatpush3.bf16.msra.mxu0 %v1290_v4  ;;  %1011 = vmatprep.mubr.msk.f32.mxu0 %vm1238_vm0, %v1239_v6 }
   0xd   :  { %1084 = vmatprep.subr.bf16.mxu0 %v1237_v3  ;;  %p1197_p4 = pnand %p1196_p3, %p1190_p0 }
  0x10   :  { %1086 = vmatpush3.bf16.msra.mxu0 %v1301_v7 }
  0x11   :  { %1093 = vmatprep.subr.bf16.mxu0 %v1237_v3 }
  0xde   :  { %v99_v10 = vpop.f32.mrb[0].mxu0 }
  0xdf   :  { %v103_v11 = vadd.f32 %v99_v10, %v28_v9  ;;  %v991_v12 = vpop.f32.mrb[1].mxu0 }
  0xe1   :  { %1125 = vtanh.f32 %v103_v11  ;;  %v912_v15 = vmul.f32 -1.442695, %v103_v11 }
  0xe3   :  { %1127 = vpow2.f32 %v912_v15 }
  0xeb   :  { %v1126_v13 = vpop.eup %1125 }
  0xec   :  { %117 = vrot.lane.b32.xlu0 %v1126_v13, %s1240_s7 }
  0xed   :  { %v1128_v16 = vpop.eup %1127 }
  0xee   :  { %v107_v17 = vadd.f32 1.0, %v1128_v16 }
  0xf0   :  { %112 = vrot.lane.b32.xlu0 %v27_v14, %s1241_s10  ;;  %1129 = vrcp.f32 %v107_v17 }
  0xfa   :  { %v1130_v18 = vpop.eup %1129 }
 0x15e   :  { %v118_v19 = vpop.permute.xlu0 %117 }
 0x15f   :  { %v120_v20 = vmul.f32 %v1130_v18, %v118_v19 }
 0x161   :  { %122 = vrot.lane.b32.xlu1 %v120_v20, %s1241_s10 }
 0x162   :  { %v113_v21 = vpop.permute.xlu0 %112 }
 0x163   :  { %v115_v22 = vmul.f32 %v1130_v18, %v113_v21 }
 0x1d3   :  { %v123_v23 = vpop.permute.xlu1 %122 }
 0x1d4   :  { %v125_v24 = vadd.f32 %v123_v23, %v115_v22  ;;  %v925_v23 = vld [vmem:[%s1473_s0 + $0x8] sm:$0x3] }
 0x1d6   :  { %1131 = vtanh.f32 %v125_v24 }
 0x1e0   :  { %v1132_v25 = vpop.eup %1131 }
 0x1e1   :  { %128 = vrot.lane.b32.xlu1 %v1132_v25, %s1240_s7 }
 0x253   :  { %v129_v26 = vpop.permute.xlu1 %128 }
 0x254   :  { %v131_v27 = vmul.f32 %v1130_v18, %v129_v26 }
 0x256   :  { %133 = vrot.lane.b32.xlu0 %v131_v27, %s1241_s10 }
 0x2c8   :  { %v134_v28 = vpop.permute.xlu0 %133 }
 0x2c9   :  { %137 = vst.msk [vmem:[%s1477_s4] sm:$0x3] %vm136_vm2, %v134_v28  ;;  %1001 = vmatmul.mubr.msk.f32.vlgmr.msra.gmra.mrb[0].mxu1 %vm29_vm1, %v134_v28 }
 0x2ca   :  { %1089 = vmatpush3.bf16.msra.mxu1 %v1290_v4  ;;  %1022 = vmatprep.mubr.msk.f32.mxu1 %vm1238_vm0, %v1239_v6 }
 0x2cb   :  { %1090 = vmatprep.subr.bf16.mxu1 %v1237_v3 }
 0x2ce   :  { %1092 = vmatpush3.bf16.msra.mxu1 %v1301_v7 }
 0x2cf   :  { %1099 = vmatprep.subr.bf16.mxu1 %v1237_v3 }
 0x39c   :  { %v208_v30 = vpop.f32.mrb[0].mxu1 }
 0x39d   :  { %v212_v31 = vadd.f32 %v913_v29, %v208_v30  ;;  %v1002_v32 = vpop.f32.mrb[1].mxu1 }
 0x39f   :  { %1133 = vtanh.f32 %v212_v31  ;;  %v915_v34 = vmul.f32 -1.442695, %v212_v31 }
 0x3a1   :  { %1135 = vpow2.f32 %v915_v34 }
 0x3a9   :  { %v1134_v33 = vpop.eup %1133 }
 0x3aa   :  { %222 = vrot.lane.b32.xlu1 %v1134_v33, %s1240_s7 }
 0x3ab   :  { %v1136_v35 = vpop.eup %1135 }
 0x3ac   :  { %v216_v36 = vadd.f32 1.0, %v1136_v35 }
 0x3ae   :  { %1137 = vrcp.f32 %v216_v36 }
 0x3b8   :  { %v1138_v37 = vpop.eup %1137 }
 0x3b9   :  { %v220_v40 = vmul.f32 %v1138_v37, %v125_v24 }
 0x41c   :  { %v223_v38 = vpop.permute.xlu1 %222 }
 0x41d   :  { %v225_v39 = vmul.f32 %v1138_v37, %v223_v38 }
 0x41f   :  { %227 = vrot.lane.b32.xlu0 %v225_v39, %s1241_s10 }
 0x491   :  { %v228_v41 = vpop.permute.xlu0 %227 }
 0x492   :  { %v230_v42 = vadd.f32 %v228_v41, %v220_v40  ;;  %v929_v41 = vld [vmem:[%s1473_s0 + $0xa] sm:$0x3] }
 0x494   :  { %1139 = vtanh.f32 %v230_v42 }
 0x49e   :  { %v1140_v43 = vpop.eup %1139 }
 0x49f   :  { %233 = vrot.lane.b32.xlu1 %v1140_v43, %s1240_s7 }
 0x511   :  { %v234_v44 = vpop.permute.xlu1 %233 }
 0x512   :  { %v236_v45 = vmul.f32 %v1138_v37, %v234_v44 }
 0x514   :  { %238 = vrot.lane.b32.xlu0 %v236_v45, %s1241_s10 }
 0x586   :  { %v239_v46 = vpop.permute.xlu0 %238 }
 0x587   :  { %916 = vst.msk [vmem:[%s1477_s4 + $0x2] sm:$0x3] %vm136_vm2, %v239_v46  ;;  %1012 = vmatmul.mubr.msk.f32.vlgmr.msra.gmra.mrb[2].mxu0 %vm29_vm1, %v239_v46 }
 0x588   :  { %1095 = vmatpush3.bf16.msra.mxu0 %v1290_v4  ;;  %1033 = vmatprep.mubr.msk.f32.mxu0 %vm1238_vm0, %v1239_v6 }
 0x589   :  { %1096 = vmatprep.subr.bf16.mxu0 %v1237_v3 }
 0x58c   :  { %1098 = vmatpush3.bf16.msra.mxu0 %v1301_v7 }
 0x58d   :  { %1105 = vmatprep.subr.bf16.mxu0 %v1237_v3 }
 0x65a   :  { %v313_v48 = vpop.f32.mrb[2].mxu0 }
 0x65b   :  { %v317_v49 = vadd.f32 %v917_v47, %v313_v48  ;;  %v1013_v50 = vpop.f32.mrb[3].mxu0 }
 0x65d   :  { %1141 = vtanh.f32 %v317_v49  ;;  %v919_v52 = vmul.f32 -1.442695, %v317_v49 }
 0x65f   :  { %1143 = vpow2.f32 %v919_v52 }
 0x667   :  { %v1142_v51 = vpop.eup %1141 }
 0x668   :  { %327 = vrot.lane.b32.xlu1 %v1142_v51, %s1240_s7 }
 0x669   :  { %v1144_v53 = vpop.eup %1143 }
 0x66a   :  { %v321_v54 = vadd.f32 1.0, %v1144_v53 }
 0x66c   :  { %1145 = vrcp.f32 %v321_v54 }
 0x676   :  { %v1146_v55 = vpop.eup %1145 }
 0x677   :  { %v325_v58 = vmul.f32 %v1146_v55, %v230_v42 }
 0x6da   :  { %v328_v56 = vpop.permute.xlu1 %327 }
 0x6db   :  { %v330_v57 = vmul.f32 %v1146_v55, %v328_v56 }
 0x6dd   :  { %332 = vrot.lane.b32.xlu0 %v330_v57, %s1241_s10 }
 0x74f   :  { %v333_v59 = vpop.permute.xlu0 %332 }
 0x750   :  { %v335_v60 = vadd.f32 %v333_v59, %v325_v58 }
 0x752   :  { %1147 = vtanh.f32 %v335_v60 }
 0x75c   :  { %v1148_v61 = vpop.eup %1147 }
 0x75d   :  { %338 = vrot.lane.b32.xlu1 %v1148_v61, %s1240_s7 }
 0x7cf   :  { %v339_v62 = vpop.permute.xlu1 %338 }
 0x7d0   :  { %v341_v63 = vmul.f32 %v1146_v55, %v339_v62  ;;  %v933_v55 = vld [vmem:[%s1473_s0 + $0xc] sm:$0x3] }
 0x7d2   :  { %343 = vrot.lane.b32.xlu0 %v341_v63, %s1241_s10 }
 0x844   :  { %v344_v0 = vpop.permute.xlu0 %343 }
 0x845   :  { %920 = vst.msk [vmem:[%s1477_s4 + $0x4] sm:$0x3] %vm136_vm2, %v344_v0  ;;  %1023 = vmatmul.mubr.msk.f32.vlgmr.msra.gmra.mrb[2].mxu1 %vm29_vm1, %v344_v0 }
 0x846   :  { %1101 = vmatpush3.bf16.msra.mxu1 %v1290_v4  ;;  %1044 = vmatprep.mubr.msk.f32.mxu1 %vm1238_vm0, %v1239_v6 }
 0x847   :  { %1102 = vmatprep.subr.bf16.mxu1 %v1237_v3 }
 0x84a   :  { %1104 = vmatpush3.bf16.msra.mxu1 %v1301_v7 }
 0x84b   :  { %1111 = vmatprep.subr.bf16.mxu1 %v1237_v3 }
 0x918   :  { %v418_v2 = vpop.f32.mrb[2].mxu1 }
 0x919   :  { %v422_v5 = vadd.f32 %v921_v1, %v418_v2  ;;  %v1024_v8 = vpop.f32.mrb[3].mxu1 }
 0x91b   :  { %1149 = vtanh.f32 %v422_v5  ;;  %v923_v10 = vmul.f32 -1.442695, %v422_v5 }
 0x91d   :  { %1151 = vpow2.f32 %v923_v10 }
 0x925   :  { %v1150_v9 = vpop.eup %1149 }
 0x926   :  { %432 = vrot.lane.b32.xlu1 %v1150_v9, %s1240_s7 }
 0x927   :  { %v1152_v11 = vpop.eup %1151 }
 0x928   :  { %v426_v12 = vadd.f32 1.0, %v1152_v11 }
 0x92a   :  { %1153 = vrcp.f32 %v426_v12 }
 0x934   :  { %v1154_v13 = vpop.eup %1153 }
 0x935   :  { %v430_v16 = vmul.f32 %v1154_v13, %v335_v60 }
 0x998   :  { %v433_v14 = vpop.permute.xlu1 %432 }
 0x999   :  { %v435_v15 = vmul.f32 %v1154_v13, %v433_v14 }
 0x99b   :  { %437 = vrot.lane.b32.xlu0 %v435_v15, %s1241_s10 }
 0xa0d   :  { %v438_v17 = vpop.permute.xlu0 %437 }
 0xa0e   :  { %v440_v18 = vadd.f32 %v438_v17, %v430_v16 }
 0xa10   :  { %1155 = vtanh.f32 %v440_v18 }
 0xa1a   :  { %v1156_v19 = vpop.eup %1155 }
 0xa1b   :  { %443 = vrot.lane.b32.xlu1 %v1156_v19, %s1240_s7 }
 0xa8d   :  { %v444_v20 = vpop.permute.xlu1 %443 }
 0xa8e   :  { %v446_v21 = vmul.f32 %v1154_v13, %v444_v20  ;;  %v937_v13 = vld [vmem:[%s1473_s0 + $0xe] sm:$0x3]  ;;  %s1242_s0 = smov 96  }
 0xa90   :  { %448 = vrot.lane.b32.xlu0 %v446_v21, %s1241_s10 }
 0xb02   :  { %v449_v22 = vpop.permute.xlu0 %448 }
 0xb03   :  { %924 = vst.msk [vmem:[%s1477_s4 + $0x6] sm:$0x3] %vm136_vm2, %v449_v22  ;;  %1034 = vmatmul.mubr.msk.f32.vlgmr.msra.gmra.mrb[4].mxu0 %vm29_vm1, %v449_v22 }
 0xb04   :  { %1107 = vmatpush3.bf16.msra.mxu0 %v1290_v4  ;;  %1055 = vmatprep.mubr.msk.f32.mxu0 %vm1238_vm0, %v1239_v6 }
 0xb05   :  { %1108 = vmatprep.subr.bf16.mxu0 %v1237_v3 }
 0xb08   :  { %1110 = vmatpush3.bf16.msra.mxu0 %v1301_v7 }
 0xbd6   :  { %v523_v24 = vpop.f32.mrb[4].mxu0 }
 0xbd7   :  { %v527_v25 = vadd.f32 %v925_v23, %v523_v24  ;;  %v1035_v26 = vpop.f32.mrb[5].mxu0 }
 0xbd9   :  { %1157 = vtanh.f32 %v527_v25  ;;  %v927_v28 = vmul.f32 -1.442695, %v527_v25 }
 0xbdb   :  { %1159 = vpow2.f32 %v927_v28 }
 0xbe3   :  { %v1158_v27 = vpop.eup %1157 }
 0xbe4   :  { %537 = vrot.lane.b32.xlu1 %v1158_v27, %s1240_s7 }
 0xbe5   :  { %v1160_v29 = vpop.eup %1159 }
 0xbe6   :  { %v531_v30 = vadd.f32 1.0, %v1160_v29 }
 0xbe8   :  { %1161 = vrcp.f32 %v531_v30 }
 0xbf2   :  { %v1162_v31 = vpop.eup %1161 }
 0xbf3   :  { %v535_v34 = vmul.f32 %v1162_v31, %v440_v18 }
 0xc56   :  { %v538_v32 = vpop.permute.xlu1 %537 }
 0xc57   :  { %v540_v33 = vmul.f32 %v1162_v31, %v538_v32 }
 0xc59   :  { %542 = vrot.lane.b32.xlu0 %v540_v33, %s1241_s10 }
 0xccb   :  { %v543_v35 = vpop.permute.xlu0 %542 }
 0xccc   :  { %v545_v36 = vadd.f32 %v543_v35, %v535_v34 }
 0xcce   :  { %1163 = vtanh.f32 %v545_v36 }
 0xcd8   :  { %v1164_v37 = vpop.eup %1163 }
 0xcd9   :  { %548 = vrot.lane.b32.xlu1 %v1164_v37, %s1240_s7 }
 0xd4b   :  { %v549_v38 = vpop.permute.xlu1 %548 }
 0xd4c   :  { %v551_v39 = vmul.f32 %v1162_v31, %v549_v38 }
 0xd4e   :  { %553 = vrot.lane.b32.xlu0 %v551_v39, %s1241_s10 }
 0xdc0   :  { %v554_v40 = vpop.permute.xlu0 %553 }
 0xdc1   :  { %928 = vst.msk [vmem:[%s1477_s4 + $0x8] sm:$0x3] %vm136_vm2, %v554_v40  ;;  %1045 = vmatmul.mubr.msk.f32.vlgmr.msra.gmra.mrb[4].mxu1 %vm29_vm1, %v554_v40 }
 0xdc2   :  { %1113 = vmatpush3.bf16.msra.mxu1 %v1290_v4  ;;  %1066 = vmatprep.mubr.msk.f32.mxu1 %vm1238_vm0, %v1239_v6 }
 0xdc3   :  { %1114 = vmatprep.subr.bf16.mxu1 %v1237_v3 }
 0xdc6   :  { %1116 = vmatpush3.bf16.msra.mxu1 %v1301_v7 }
 0xe94   :  { %v628_v42 = vpop.f32.mrb[4].mxu1 }
 0xe95   :  { %v632_v43 = vadd.f32 %v929_v41, %v628_v42  ;;  %v1046_v44 = vpop.f32.mrb[5].mxu1 }
 0xe97   :  { %1165 = vtanh.f32 %v632_v43  ;;  %v931_v46 = vmul.f32 -1.442695, %v632_v43 }
 0xe99   :  { %1167 = vpow2.f32 %v931_v46 }
 0xea1   :  { %v1166_v45 = vpop.eup %1165 }
 0xea2   :  { %642 = vrot.lane.b32.xlu1 %v1166_v45, %s1240_s7 }
 0xea3   :  { %v1168_v4 = vpop.eup %1167 }
 0xea4   :  { %v636_v47 = vadd.f32 1.0, %v1168_v4 }
 0xea6   :  { %1169 = vrcp.f32 %v636_v47 }
 0xeb0   :  { %v1170_v6 = vpop.eup %1169 }
 0xeb1   :  { %v640_v7 = vmul.f32 %v1170_v6, %v545_v36 }
 0xf14   :  { %v643_v3 = vpop.permute.xlu1 %642 }
 0xf15   :  { %v645_v48 = vmul.f32 %v1170_v6, %v643_v3 }
 0xf17   :  { %647 = vrot.lane.b32.xlu0 %v645_v48, %s1241_s10 }
 0xf89   :  { %v648_v49 = vpop.permute.xlu0 %647 }
 0xf8a   :  { %v650_v50 = vadd.f32 %v648_v49, %v640_v7 }
 0xf8c   :  { %1171 = vtanh.f32 %v650_v50 }
 0xf96   :  { %v1172_v51 = vpop.eup %1171 }
 0xf97   :  { %653 = vrot.lane.b32.xlu1 %v1172_v51, %s1240_s7 }
0x1009   :  { %v654_v52 = vpop.permute.xlu1 %653 }
0x100a   :  { %v656_v53 = vmul.f32 %v1170_v6, %v654_v52 }
0x100c   :  { %658 = vrot.lane.b32.xlu0 %v656_v53, %s1241_s10 }
0x107e   :  { %v659_v54 = vpop.permute.xlu0 %658 }
0x107f   :  { %932 = vst.msk [vmem:[%s1477_s4 + $0xa] sm:$0x3] %vm136_vm2, %v659_v54  ;;  %1056 = vmatmul.mubr.msk.f32.vlgmr.msra.gmra.mrb[6].mxu0 %vm29_vm1, %v659_v54 }
0x1152   :  { %v733_v56 = vpop.f32.mrb[6].mxu0 }
0x1153   :  { %v737_v57 = vadd.f32 %v933_v55, %v733_v56  ;;  %v1057_v58 = vpop.f32.mrb[7].mxu0 }
0x1155   :  { %1173 = vtanh.f32 %v737_v57  ;;  %v935_v60 = vmul.f32 -1.442695, %v737_v57 }
0x1157   :  { %1175 = vpow2.f32 %v935_v60 }
0x115f   :  { %v1174_v59 = vpop.eup %1173 }
0x1160   :  { %747 = vrot.lane.b32.xlu1 %v1174_v59, %s1240_s7 }
0x1161   :  { %v1176_v61 = vpop.eup %1175 }
0x1162   :  { %v741_v62 = vadd.f32 1.0, %v1176_v61 }
0x1164   :  { %1177 = vrcp.f32 %v741_v62 }
0x116e   :  { %v1178_v63 = vpop.eup %1177 }
0x116f   :  { %v745_v2 = vmul.f32 %v1178_v63, %v650_v50 }
0x11d2   :  { %v748_v0 = vpop.permute.xlu1 %747 }
0x11d3   :  { %v750_v1 = vmul.f32 %v1178_v63, %v748_v0 }
0x11d5   :  { %752 = vrot.lane.b32.xlu0 %v750_v1, %s1241_s10 }
0x1247   :  { %v753_v5 = vpop.permute.xlu0 %752 }
0x1248   :  { %v755_v8 = vadd.f32 %v753_v5, %v745_v2 }
0x124a   :  { %1179 = vtanh.f32 %v755_v8 }
0x1254   :  { %v1180_v9 = vpop.eup %1179 }
0x1255   :  { %758 = vrot.lane.b32.xlu1 %v1180_v9, %s1240_s7 }
0x12c7   :  { %v759_v10 = vpop.permute.xlu1 %758 }
0x12c8   :  { %v761_v11 = vmul.f32 %v1178_v63, %v759_v10 }
0x12ca   :  { %763 = vrot.lane.b32.xlu0 %v761_v11, %s1241_s10 }
0x133c   :  { %v764_v12 = vpop.permute.xlu0 %763 }
0x133d   :  { %936 = vst.msk [vmem:[%s1477_s4 + $0xc] sm:$0x3] %vm136_vm2, %v764_v12  ;;  %1067 = vmatmul.mubr.msk.f32.vlgmr.msra.gmra.mrb[6].mxu1 %vm29_vm1, %v764_v12 }
0x1410   :  { %v838_v14 = vpop.f32.mrb[6].mxu1 }
0x1411   :  { %v842_v15 = vadd.f32 %v937_v13, %v838_v14  ;;  %v1068_v16 = vpop.f32.mrb[7].mxu1 }
0x1413   :  { %1181 = vtanh.f32 %v842_v15  ;;  %v939_v18 = vmul.f32 -1.442695, %v842_v15 }
0x1415   :  { %1183 = vpow2.f32 %v939_v18 }
0x141d   :  { %v1182_v17 = vpop.eup %1181 }
0x141e   :  { %852 = vrot.lane.b32.xlu1 %v1182_v17, %s1240_s7 }
0x141f   :  { %v1184_v19 = vpop.eup %1183 }
0x1420   :  { %v846_v20 = vadd.f32 1.0, %v1184_v19 }
0x1422   :  { %1185 = vrcp.f32 %v846_v20 }
0x142c   :  { %v1186_v21 = vpop.eup %1185 }
0x142d   :  { %v850_v24 = vmul.f32 %v1186_v21, %v755_v8 }
0x1490   :  { %v853_v22 = vpop.permute.xlu1 %852 }
0x1491   :  { %v855_v23 = vmul.f32 %v1186_v21, %v853_v22 }
0x1493   :  { %857 = vrot.lane.b32.xlu0 %v855_v23, %s1241_s10 }
0x1505   :  { %v858_v25 = vpop.permute.xlu0 %857 }
0x1506   :  { %v860_v26 = vadd.f32 %v858_v25, %v850_v24 }
0x1508   :  { %1187 = vtanh.f32 %v860_v26 }
0x1512   :  { %v1188_v27 = vpop.eup %1187 }
0x1513   :  { %863 = vrot.lane.b32.xlu1 %v1188_v27, %s1240_s7 }
0x1517   :  { %875 = vrot.lane.b32.xlu1 %v860_v26, %s1242_s0 }
0x1585   :  { %v864_v28 = vpop.permute.xlu1 %863 }
0x1586   :  { %v866_v29 = vmul.f32 %v1186_v21, %v864_v28 }
0x1588   :  { %868 = vrot.lane.b32.xlu0 %v866_v29, %s1241_s10 }
0x1589   :  { %v876_v30 = vpop.permute.xlu1 %875 }
0x158a   :  { %878 = vst.msk [vmem:[#allocation4] sm:$0x3] %vm136_vm2, %v876_v30 }
0x158b   :  { %1200 = shalt.err (!%p1197_p4)
}
0x158c   :  { %s1201_s17 = scalar_lea.hbm %s1479_s6, 32 }
0x158d   :  { %p1202_p5 = scmp.ne.s32.totalorder %s1479_s6, %s1201_s17  ;;  %p1205_p6 = scmp.lt.u32.totalorder %s1201_s17, %s1479_s6 }
0x158f   :  { %p1207_p7 = pnand %p1205_p6, %p1202_p5 }
0x1591   :  { %1210 = shalt.err (!%p1207_p7)
}
0x1592   :  { %900 = dma.vmem_to_hbm [thread:$0]  %s898_s14, 32, %s1479_s6, [#allocation5]  }
0x1593   :  { %s1244_s23 = smov [#allocation2]  }
0x1594   :  { %s887_s24 = sshll.u32 %s1244_s23, 4  ;;  %s888_s24 = int_to_ptr.vmem [resolvable:$true] %s887_s24 }
0x1595   :  { %s1211_s27 = scalar_lea.vmem %s888_s24, 32  ;;  %p1216_p9 = scmp.lt.s32.totalorder %s888_s24, %s888_s24 }
0x1596   :  { %p1212_p8 = scmp.ne.s32.totalorder %s888_s24, %s1211_s27  ;;  %p1217_p10 = scmp.lt.s32.totalorder %s1211_s27, %s1211_s27 }
0x1598   :  { %p1218_p11 = por %p1217_p10, %p1216_p9 }
0x159a   :  { %p1219_p12 = pnand %p1218_p11, %p1212_p8 }
0x15fa   :  { %v869_v31 = vpop.permute.xlu0 %868 }
0x15fb   :  { %940 = vst.msk [vmem:[%s1477_s4 + $0xe] sm:$0x3] %vm136_vm2, %v869_v31  ;;  %873 = vst.msk [vmem:[#allocation2] sm:$0x3] %vm136_vm2, %v869_v31 }
0x15fc   :  { %1222 = shalt.err (!%p1219_p12)
}
0x15fd   :  { %s1223_s1 = scalar_lea.hbm %s1478_s5, 32 }
0x15fe   :  { %p1224_p13 = scmp.ne.s32.totalorder %s1478_s5, %s1223_s1  ;;  %p1227_p0 = scmp.lt.u32.totalorder %s1223_s1, %s1478_s5 }
0x1600   :  { %p1229_p1 = pnand %p1227_p0, %p1224_p13 }
0x1602   :  { %1232 = shalt.err (!%p1229_p1)
}
0x1603   :  { %890 = dma.vmem_to_hbm [thread:$0]  %s888_s24, 32, %s1478_s5, [#allocation3]  }
0x1604   :  { %1233 = dma.done.wait [#allocation3], 32  }
0x1605   :  { %1234 = vsyncadd [#allocation3], 4294967264 }
0x1606   :  { %1235 = dma.done.wait [#allocation5], 32  }
0x1607   :  { %1236 = vsyncadd [#allocation5], 4294967264 }
0x1608   :  { %909 = vsyncpa [#allocation3], 1 }
0x1609   :  { %910 = vsyncpa [#allocation5], 1 }

</bundles_post_ra>
